<compile_context>
chip_gen: v6e
topology: v6e:2x2x1
jax: 0.10.0
libtpu: 0.0.40
codegen_flags: <defaults>
</compile_context>

<pallas_src>
import functools

import jax
import jax.numpy as jnp
from jax import lax
from jax.experimental import pallas as pl
from jax.experimental.pallas import tpu as pltpu

EPS_BN = 1e-5
EPS_BOX = 1e-6


# ----------------------------------------------------------------------------
# Pass 1: per-channel, per-batch partial statistics over spatial tiles.
# ----------------------------------------------------------------------------
def _stats_kernel(x_ref, sum_ref, sq_ref):
    # x:   (1, C, TS) tile (spatial on lanes)
    # sum/sq: (1, C, 1) per-batch resident accumulators (batch axis 'parallel',
    #         spatial axis 'arbitrary' -> init when the spatial index is 0).
    @pl.when(pl.program_id(1) == 0)
    def _():
        sum_ref[...] = jnp.zeros_like(sum_ref)
        sq_ref[...] = jnp.zeros_like(sq_ref)

    x = x_ref[0]                                          # (C, TS)
    sum_ref[0] += jnp.sum(x, axis=1, keepdims=True)       # single read of x
    sq_ref[0] += jnp.sum(x * x, axis=1, keepdims=True)


# ----------------------------------------------------------------------------
# Pass 2: fused BN-apply + spatially-adaptive affine modulation, per tile.
# ----------------------------------------------------------------------------
def _apply_kernel(x_ref, bbox_ref, wb_ref, scale_ref, shift_ref, out_ref, *,
                  c, cpad):
    # x:     (1, C, TS)          feature tile
    # bbox:  (1, O, TS)          bbox tile
    # wb:    (1, 2*cpad+8, O)    rows [0:C)        : inv_std_c * weight[c,o]
    #                            rows [cpad:cpad+C): shift_c * weight[c,o] + bias[c,o]
    #                            row  2*cpad       : ones (bbox denominator)
    # scale: (C, 1)  inv_std     shift: (C, 1)  -mean*inv_std
    x = x_ref[0]                                          # (C, TS)
    bbox = bbox_ref[0]                                    # (O, TS)
    wb = wb_ref[0]                                        # (2*cpad+8, O)

    # MXU: weight numerator, bias numerator and bbox denominator in ONE
    # contraction (the ones row makes the denominator free).
    num = jnp.dot(wb, bbox, preferred_element_type=jnp.float32)   # (2*cpad+8, TS)

    denom = num[2 * cpad:2 * cpad + 1, :] + EPS_BOX               # (1, TS)
    # One small exact reciprocal + multiplies instead of (C, TS) divides.
    inv_d = pl.reciprocal(denom, approx=False)

    # BN affine already folded into wb:
    #   out = scale*x + shift + inv_d * (num_w' * x + num_b')
    mod = num[:c, :] * x + num[cpad:cpad + c, :]
    out_ref[0] = x * scale_ref[...] + shift_ref[...] + inv_d * mod


# ----------------------------------------------------------------------------
# Glue: spectral norm of the Linear weights (parameter setup, plain JAX).
# Deterministic converged power iteration instead of PyTorch's stateful
# single step per forward.
# ----------------------------------------------------------------------------
def _spectral_normalize(w, n_iters=30):
    u = jnp.ones((w.shape[0],), jnp.float32) / jnp.sqrt(w.shape[0])

    def body(_, u):
        v = w.T @ u
        v = v / (jnp.linalg.norm(v) + 1e-12)
        u_new = w @ v
        return u_new / (jnp.linalg.norm(u_new) + 1e-12)

    u = lax.fori_loop(0, n_iters, body, u)
    v = w.T @ u
    v = v / (jnp.linalg.norm(v) + 1e-12)
    sigma = u @ (w @ v)
    return w / sigma


# ----------------------------------------------------------------------------
# Generation-aware tiling.
# ----------------------------------------------------------------------------
def _tpu_generation():
    try:
        kind = jax.devices()[0].device_kind.lower()
    except Exception:
        return "unknown"
    if "v5 lite" in kind or "v5lite" in kind or "v5e" in kind:
        return "v5e"
    if "v6" in kind:
        return "v6"
    if "v7" in kind:
        return "v7"
    return "unknown"


# Streamed bytes per grid step (before the x2 double-buffering factor).
_TILE_BUDGET_BYTES = {"v5e": 6 << 20, "v6": 12 << 20, "v7": 8 << 20,
                      "unknown": 8 << 20}


def _plan_spatial_tiles(s, bytes_per_pixel, batch, budget_bytes):
    """Pick a lane tile (multiple of 128) independent of s's factorization.

    Returns (s_pad, ts, n_tiles) with s_pad = n_tiles * ts >= s; padding is at
    most (n_tiles - 1) * 128 pixels of zeros.
    """
    chunks = -(-s // 128)                                  # 128-lane chunks
    max_chunks = max(1, budget_bytes // (128 * bytes_per_pixel))
    # Keep >= ~8 grid steps so both v7x cores get work and the pipeline can
    # overlap (no single-giant-tile collapse); no effect when chunks is small.
    min_tiles = min(chunks, max(1, -(-8 // max(1, batch))))
    n_tiles = min(chunks, max(-(-chunks // max_chunks), min_tiles))
    cpt = -(-chunks // n_tiles)                            # chunks per tile
    n_tiles = -(-chunks // cpt)
    ts = cpt * 128
    return n_tiles * ts, ts, n_tiles


def _vmem_limit_bytes(per_step_bytes, gen):
    """Scoped-VMEM request: 2x (double buffering) + headroom, generation-capped."""
    cap = (56 << 20) if gen == "v7" else (112 << 20)       # v7x: 64 MiB physical
    need = 2 * per_step_bytes + (8 << 20)
    return int(min(cap, max(32 << 20, need)))


def _pad_spatial(a, s_pad):
    s = a.shape[-1]
    if s_pad == s:
        return a
    return jnp.pad(a, ((0, 0), (0, 0), (0, s_pad - s)))


# ----------------------------------------------------------------------------
# Public wrapper: mirrors SpatialAdaptiveSynBatchNorm2d.forward (NCHW in/out).
# ----------------------------------------------------------------------------
def spatial_adaptive_syn_batchnorm2d(x_nchw, vector, bbox, params):
    x_nchw = x_nchw.astype(jnp.float32)
    b, c, h, w = x_nchw.shape
    _, o, bh, bw = bbox.shape
    if (bh, bw) != (h, w):
        # TODO(synk): F.interpolate(mode='bilinear') edge semantics only
        # approximately matched by jax.image.resize (not exercised in demo).
        bbox = jax.image.resize(bbox, (b, o, h, w), method="bilinear")
    bbox = bbox.astype(jnp.float32)

    s = h * w
    x_flat = x_nchw.reshape(b, c, s)          # contiguous reshape, no HBM traffic
    bbox_flat = bbox.reshape(b, o, s)

    gen = _tpu_generation()
    budget = _TILE_BUDGET_BYTES[gen]

    # --- pass 1: per-channel batch stats (per-batch partials, megacore) -------
    s_pad1, ts1, n1 = _plan_spatial_tiles(s, 4 * c, b, budget)
    x1 = _pad_spatial(x_flat, s_pad1)         # zeros do not change sum / sumsq
    per_step1 = 4 * c * ts1 + 8 * c
    sums, sqs = pl.pallas_call(
        _stats_kernel,
        out_shape=(jax.ShapeDtypeStruct((b, c, 1), jnp.float32),
                   jax.ShapeDtypeStruct((b, c, 1), jnp.float32)),
        grid_spec=pltpu.PrefetchScalarGridSpec(
            num_scalar_prefetch=0,
            grid=(b, n1),
            in_specs=[pl.BlockSpec((1, c, ts1), lambda bi, si: (bi, 0, si))],
            out_specs=(pl.BlockSpec((1, c, 1), lambda bi, si: (bi, 0, 0)),
                       pl.BlockSpec((1, c, 1), lambda bi, si: (bi, 0, 0)))),
        compiler_params=pltpu.CompilerParams(
            dimension_semantics=("parallel", "arbitrary"),
            vmem_limit_bytes=_vmem_limit_bytes(per_step1, gen)),
    )(x1)

    # Tiny finalize (2*C numbers) in plain JAX; divide by the TRUE pixel count.
    n = float(b * s)
    ch_sum = jnp.sum(sums, axis=(0, 2))                           # (C,)
    ch_sq = jnp.sum(sqs, axis=(0, 2))
    mean = ch_sum / n
    var = jnp.maximum(ch_sq / n - mean * mean, 0.0)               # f32 acc; guard
    inv_std = lax.rsqrt(var + EPS_BN)
    shift_c = -mean * inv_std
    scale = inv_std.reshape(c, 1)
    shift = shift_c.reshape(c, 1)

    # --- spectral-normalized projections + BN-affine fold (tiny, plain JAX) ---
    w_w = _spectral_normalize(params["weight_proj_w"])            # (C, num_w)
    b_w = _spectral_normalize(params["bias_proj_w"])              # (C, num_w)
    w_obj = (vector @ w_w.T + params["weight_proj_b"]).reshape(b, o, c)
    b_obj = (vector @ b_w.T + params["bias_proj_b"]).reshape(b, o, c)
    # Fold BN affine into the per-object rows (mathematically identical):
    wp = w_obj * inv_std[None, None, :]                           # (B, O, C)
    bp = w_obj * shift_c[None, None, :] + b_obj                   # (B, O, C)
    cpad = ((c + 7) // 8) * 8                                     # sublane-align rows
    rows = 2 * cpad + 8
    pad_c = cpad - c
    wp = jnp.pad(wp, ((0, 0), (0, 0), (0, pad_c)))
    bp = jnp.pad(bp, ((0, 0), (0, 0), (0, pad_c)))
    tail = jnp.concatenate([jnp.ones((b, o, 1), jnp.float32),     # ones row -> denom
                            jnp.zeros((b, o, 7), jnp.float32)], axis=2)
    wbp = jnp.concatenate([wp, bp, tail], axis=2)                 # (B, O, rows)
    wbp = jnp.transpose(wbp, (0, 2, 1))                           # (B, rows, O), tiny

    # --- pass 2: fused normalize + spatially-adaptive modulation --------------
    s_pad2, ts2, n2 = _plan_spatial_tiles(s, 4 * (2 * c + o), b, budget)
    x2 = _pad_spatial(x_flat, s_pad2)
    bbox2 = _pad_spatial(bbox_flat, s_pad2)
    per_step2 = 4 * ts2 * (2 * c + o) + 4 * rows * o + 8 * c
    kern = functools.partial(_apply_kernel, c=c, cpad=cpad)
    out_flat = pl.pallas_call(
        kern,
        out_shape=jax.ShapeDtypeStruct((b, c, s_pad2), jnp.float32),
        grid_spec=pltpu.PrefetchScalarGridSpec(
            num_scalar_prefetch=0,
            grid=(b, n2),
            in_specs=[pl.BlockSpec((1, c, ts2), lambda bi, si: (bi, 0, si)),
                      pl.BlockSpec((1, o, ts2), lambda bi, si: (bi, 0, si)),
                      pl.BlockSpec((1, rows, o), lambda bi, si: (bi, 0, 0)),
                      pl.BlockSpec((c, 1), lambda bi, si: (0, 0)),
                      pl.BlockSpec((c, 1), lambda bi, si: (0, 0))],
            out_specs=pl.BlockSpec((1, c, ts2), lambda bi, si: (bi, 0, si))),
        compiler_params=pltpu.CompilerParams(
            dimension_semantics=("parallel", "parallel"),
            vmem_limit_bytes=_vmem_limit_bytes(per_step2, gen)),
    )(x2, bbox2, wbp, scale, shift)

    return out_flat[:, :, :s].reshape(b, c, h, w)


# ----------------------------------------------------------------------------
# Pure-JAX reference (mirrors the PyTorch math, NCHW, two-pass stats).
# ----------------------------------------------------------------------------
def _reference(x, vector, bbox, params):
    b, c, h, w = x.shape
    _, o, _, _ = bbox.shape
    mean = jnp.mean(x, axis=(0, 2, 3), keepdims=True)
    var = jnp.mean((x - mean) ** 2, axis=(0, 2, 3), keepdims=True)
    out = (x - mean) / jnp.sqrt(var + EPS_BN)

    w_w = _spectral_normalize(params["weight_proj_w"])
    b_w = _spectral_normalize(params["bias_proj_w"])
    weight = (vector @ w_w.T + params["weight_proj_b"]).reshape(b, o, c)
    bias = (vector @ b_w.T + params["bias_proj_b"]).reshape(b, o, c)

    denom = jnp.sum(bbox[:, :, None], axis=1) + EPS_BOX           # (b,1,h,w)
    w_map = jnp.sum(bbox[:, :, None] * weight[..., None, None], axis=1) / denom + 1.0
    b_map = jnp.sum(bbox[:, :, None] * bias[..., None, None], axis=1) / denom
    return w_map * out + b_map


if __name__ == "__main__":
    key = jax.random.PRNGKey(0)
    b, c, h, w = 2, 4, 16, 16       # num_features = c = 4
    o, num_w = 4, 32                # latent dim kept small for the demo
    ks = jax.random.split(key, 7)

    x = jax.random.normal(ks[0], (b, c, h, w), jnp.float32)
    vector = jax.random.normal(ks[1], (b * o, num_w), jnp.float32)
    bbox = jax.random.uniform(ks[2], (b, o, h, w), jnp.float32)

    bound = 1.0 / jnp.sqrt(num_w)   # nn.Linear default init range
    params = {
        "weight_proj_w": jax.random.uniform(ks[3], (c, num_w), jnp.float32, -bound, bound),
        "weight_proj_b": jax.random.uniform(ks[4], (c,), jnp.float32, -bound, bound),
        "bias_proj_w": jax.random.uniform(ks[5], (c, num_w), jnp.float32, -bound, bound),
        "bias_proj_b": jax.random.uniform(ks[6], (c,), jnp.float32, -bound, bound),
    }

    out = spatial_adaptive_syn_batchnorm2d(x, vector, bbox, params)
    out = jax.block_until_ready(out)

    ref = _reference(x, vector, bbox, params)
    assert out.shape == (b, c, h, w)
    assert jnp.allclose(out, ref, atol=1e-4, rtol=1e-4), float(jnp.max(jnp.abs(out - ref)))
    print("KERNEL_OK")
</pallas_src>

<mosaic_0001>
module attributes {stable_mosaic.version = 11 : i64} {
  func.func @_stats_kernel(%arg0: i32, %arg1: i32, %arg2: memref<1x4x128xf32, #tpu.memory_space<vmem>>, %arg3: memref<1x4x1xf32, #tpu.memory_space<vmem>>, %arg4: memref<1x4x1xf32, #tpu.memory_space<vmem>>) attributes {dimension_semantics = [#tpu.dimension_semantics<parallel>, #tpu.dimension_semantics<arbitrary>], iteration_bounds = array<i64: 2, 2>, scalar_prefetch = 0 : i64, scratch_operands = 0 : i64, tpu.core_type = #tpu.core_type<tc>, window_params = [{transform_indices = @transform_0, window_bounds = array<i64: 1, 4, 128>}, {transform_indices = @transform_1, window_bounds = array<i64: 1, 4, 1>}, {transform_indices = @transform_2, window_bounds = array<i64: 1, 4, 1>}]} {
    %c0_i32 = arith.constant 0 : i32
    %0 = arith.cmpi eq, %arg1, %c0_i32 : i32
    %1 = arith.extui %0 : i1 to i32
    %c0_i32_0 = arith.constant 0 : i32
    %2 = arith.cmpi ne, %1, %c0_i32_0 : i32
    scf.if %2 {
      %cst_16 = arith.constant 0.000000e+00 : f32
      %22 = vector.broadcast %cst_16 : f32 to vector<1x4x1xf32>
      %c0_17 = arith.constant 0 : index
      %c0_18 = arith.constant 0 : index
      %c0_19 = arith.constant 0 : index
      %23 = vector.load %arg3[%c0_17, %c0_18, %c0_19] : memref<1x4x1xf32, #tpu.memory_space<vmem>>, vector<1x4x1xf32>
      tpu.vector_store %arg3[%c0_17, %c0_18, %c0_19], %22 {strides = array<i32>} : memref<1x4x1xf32, #tpu.memory_space<vmem>>, vector<1x4x1xf32>,
      %cst_20 = arith.constant 0.000000e+00 : f32
      %24 = vector.broadcast %cst_20 : f32 to vector<1x4x1xf32>
      %c0_21 = arith.constant 0 : index
      %c0_22 = arith.constant 0 : index
      %c0_23 = arith.constant 0 : index
      %25 = vector.load %arg4[%c0_21, %c0_22, %c0_23] : memref<1x4x1xf32, #tpu.memory_space<vmem>>, vector<1x4x1xf32>
      tpu.vector_store %arg4[%c0_21, %c0_22, %c0_23], %24 {strides = array<i32>} : memref<1x4x1xf32, #tpu.memory_space<vmem>>, vector<1x4x1xf32>,
    } else {
    }
    %c0 = arith.constant 0 : index
    %c0_1 = arith.constant 0 : index
    %c0_2 = arith.constant 0 : index
    %3 = vector.load %arg2[%c0, %c0_1, %c0_2] : memref<1x4x128xf32, #tpu.memory_space<vmem>>, vector<1x4x128xf32>
    %4 = vector.shape_cast %3 : vector<1x4x128xf32> to vector<4x128xf32>
    %c0_3 = arith.constant 0 : index
    %c0_4 = arith.constant 0 : index
    %c0_5 = arith.constant 0 : index
    %5 = vector.load %arg3[%c0_3, %c0_4, %c0_5] : memref<1x4x1xf32, #tpu.memory_space<vmem>>, vector<1x4x1xf32>
    %6 = vector.shape_cast %5 : vector<1x4x1xf32> to vector<4x1xf32>
    %cst = arith.constant dense<0.000000e+00> : vector<4xf32>
    %7 = vector.multi_reduction <add>, %4, %cst [1] : vector<4x128xf32> to vector<4xf32>
    %8 = vector.shape_cast %7 : vector<4xf32> to vector<4x1xf32>
    %9 = arith.addf %6, %8 : vector<4x1xf32>
    %c0_6 = arith.constant 0 : index
    %c0_7 = arith.constant 0 : index
    %c0_8 = arith.constant 0 : index
    %10 = vector.load %arg3[%c0_6, %c0_7, %c0_8] : memref<1x4x1xf32, #tpu.memory_space<vmem>>, vector<1x4x1xf32>
    %11 = vector.shape_cast %10 : vector<1x4x1xf32> to vector<4x1xf32>
    %12 = vector.shape_cast %9 : vector<4x1xf32> to vector<1x4x1xf32>
    tpu.vector_store %arg3[%c0_6, %c0_7, %c0_8], %12 {strides = array<i32>} : memref<1x4x1xf32, #tpu.memory_space<vmem>>, vector<1x4x1xf32>,
    %c0_9 = arith.constant 0 : index
    %c0_10 = arith.constant 0 : index
    %c0_11 = arith.constant 0 : index
    %13 = vector.load %arg4[%c0_9, %c0_10, %c0_11] : memref<1x4x1xf32, #tpu.memory_space<vmem>>, vector<1x4x1xf32>
    %14 = vector.shape_cast %13 : vector<1x4x1xf32> to vector<4x1xf32>
    %15 = arith.mulf %4, %4 : vector<4x128xf32>
    %cst_12 = arith.constant dense<0.000000e+00> : vector<4xf32>
    %16 = vector.multi_reduction <add>, %15, %cst_12 [1] : vector<4x128xf32> to vector<4xf32>
    %17 = vector.shape_cast %16 : vector<4xf32> to vector<4x1xf32>
    %18 = arith.addf %14, %17 : vector<4x1xf32>
    %c0_13 = arith.constant 0 : index
    %c0_14 = arith.constant 0 : index
    %c0_15 = arith.constant 0 : index
    %19 = vector.load %arg4[%c0_13, %c0_14, %c0_15] : memref<1x4x1xf32, #tpu.memory_space<vmem>>, vector<1x4x1xf32>
    %20 = vector.shape_cast %19 : vector<1x4x1xf32> to vector<4x1xf32>
    %21 = vector.shape_cast %18 : vector<4x1xf32> to vector<1x4x1xf32>
    tpu.vector_store %arg4[%c0_13, %c0_14, %c0_15], %21 {strides = array<i32>} : memref<1x4x1xf32, #tpu.memory_space<vmem>>, vector<1x4x1xf32>,
    return
  }
  func.func @transform_0(%arg0: i32, %arg1: i32) -> (i32, i32, i32) {
    %c0_i32 = arith.constant 0 : i32
    %c0_i32_0 = arith.constant 0 : i32
    return %arg0, %c0_i32, %arg1 : i32, i32, i32
  }
  func.func @transform_1(%arg0: i32, %arg1: i32) -> (i32, i32, i32) {
    %c0_i32 = arith.constant 0 : i32
    %c0_i32_0 = arith.constant 0 : i32
    %c0_i32_1 = arith.constant 0 : i32
    return %arg0, %c0_i32, %c0_i32_0 : i32, i32, i32
  }
  func.func @transform_2(%arg0: i32, %arg1: i32) -> (i32, i32, i32) {
    %c0_i32 = arith.constant 0 : i32
    %c0_i32_0 = arith.constant 0 : i32
    %c0_i32_1 = arith.constant 0 : i32
    return %arg0, %c0_i32, %c0_i32_0 : i32, i32, i32
  }
}

</mosaic_0001>

<bundles_post_ra>
// kernel: tpu_custom_call.1
= control target key start
LH: loop header
LB: loop body
LE: loop exit
PB: predicated region body
PF: predicated region fallthrough
CT: control target
= control target key end

     0   :  { %8 = vsyncpa [#allocation3], 0  ;;  %s646_s0 = inlined_call_operand.hbm [shape: f32[2,4,256], index: 0, kind: input, shape index: {}]   ;;  %s647_s1 = inlined_call_operand.vmem [shape: f32[2,4,1], index: 1, kind: output, shape index: {0}]   ;;  %s648_s2 = inlined_call_operand.vmem [shape: f32[2,4,1], index: 2, kind: output, shape index: {1}]  }
   0x1   :  { %10 = vsyncpa [#allocation3 + $0x1], 0  ;;  %s517_s9 = smov 0   ;;  %s519_s10 = smov 0  }
   0x2   :  { %s521_s11 = smov 0   ;;  %s523_s12 = smov 0  }
   0x3   :  { %s525_s13 = smov 0   ;;  %s527_s14 = smov 0  }
   0x4   :  { %s529_s15 = smov 0   ;;  %s531_s16 = smov 0  }
   0x5 LB: > { %s318_s17 = sadd.s32 4294967295, %s498_s16   ;;  %s25_s18 = sadd.s32 1, %s490_s14  ;;  %s498_s16 = sphi %s531_s16, %s16_s16   ;;  %s494_s15 = sphi %s529_s15, %s658_s15   ;;  %s490_s14 = sphi %s527_s14, %s657_s14   ;;  %s486_s13 = sphi %s525_s13, %s656_s13   ;;  %s482_s12 = sphi %s523_s12, %s655_s12   ;;  %s478_s11 = sphi %s521_s11, %s654_s11   ;;  %s474_s10 = sphi %s519_s10, %s653_s10   ;;  %s470_s9 = sphi %s517_s9, %s652_s9  }
   0x6   : > { %p26_p0 = scmp.ge.s32.totalorder %s25_s18, 2  ;;  %s28_s19 = sadd.s32 1, %s494_s15 }
   0x7   : > { %s37_s20 = sadd.s32 1, %s478_s11  ;;  %p44_p1 = scmp.ne.s32.totalorder %s478_s11, %s474_s10 }
   0x8   : > { %s660_s18 = smov (%p26_p0, %s25_s18), 0  ;;  %s662_s19 = smov (!%p26_p0, %s28_s19), %s494_s15 }
   0x9   : > { %s33_s21 = ssub.s32 %s490_s14, %s660_s18  ;;  %p45_p2 = scmp.eq.s32.totalorder %s498_s16, 0 }
   0xa   : > { %p30_p3 = scmp.ge.s32.totalorder %s662_s19, 2  ;;  %p50_p4 = scmp.ne.s32.totalorder %s474_s10, %s470_s9 }
   0xb   : > { %p568_p5 = por %p45_p2, %p44_p1  ;;  %p51_p6 = scmp.eq.s32.totalorder %s318_s17, 0 }
   0xc   : > { %s664_s19 = smov (%p30_p3, %s662_s19), 0  ;;  %p338_p8 = scmp.lt.s32.totalorder %s498_s16, 4 }
   0xd   : > { %p574_p7 = por %p51_p6, %p50_p4  ;;  %s32_s24 = ssub.s32 %s494_s15, %s664_s19 }
   0xe   : > { %s34_s25 = sor.u32 %s33_s21, %s32_s24  ;;  %s126_s26 = sand.u32 1, %s478_s11  }
   0xf   : > { %p35_p9 = scmp.eq.s32.totalorder %s34_s25, 0  ;;  %s322_s27 = sshll.u32 %s126_s26, 2 }
  0x10   : > { %s323_s28 = sshll.u32 %s494_s15, 1  ;;  %s130_s4 = scalar_lea.vmem [#allocation2], %s322_s27 }
  0x11   : > { %s584_s29 = scalar_select %p35_p9, %s478_s11, %s37_s20  }
  0x12   : > { %s135_s30 = sadd.s32 %s490_s14, %s323_s28  ;;  %s139_s5 = sshll.u32 %s130_s4, 4  ;;  %s140_s5 = int_to_ptr.vmem [resolvable:$true] %s139_s5 }
  0x13   : > { %s324_s3 = sshll.u32 %s135_s30, 6  ;;  %p594_p10 = pnand %p338_p8, %p568_p5 }
  0x14   : > { %s137_s8 = scalar_lea.hbm %s646_s0, %s324_s3  ;;  %p325_p11 = scmp.ge.s32.totalorder %s498_s16, 1 }
  0x15   : > { %p144_p12 = scmp.lt.s32.totalorder %s498_s16, 5  ;;  %s127_s17 = scalar_lea.sflag [#allocation3], %s126_s26 }
  0x16   : > { %p406_p13 = pneg %p594_p10  ;;  %s417_s20 = scalar_lea.vmem %s140_s5, 64 }
  0x17   : > { %p418_p0 = scmp.ne.s32.totalorder %s140_s5, %s417_s20  ;;  %s500_s21 = smov [#allocation2]  }
  0x18   : > { %s422_s24 = sshll.u32 %s500_s21, 4  ;;  %s423_s24 = int_to_ptr.vmem [resolvable:$false] %s422_s24 }
  0x19   : > { %p420_p1 = pnand %p418_p0, %p406_p13  ;;  %s424_s25 = scalar_lea.vmem %s423_s24, 128 }
  0x1a   : > { %p425_p3 = scmp.lt.s32.totalorder %s140_s5, %s423_s24  ;;  %p426_p4 = scmp.lt.s32.totalorder %s424_s25, %s417_s20 }
  0x1b   : > { %p421_p2 = pneg %p420_p1 }
  0x1c   : > { %p427_p5 = por %p426_p4, %p425_p3 }
  0x1e   : > { %p428_p6 = pnand %p427_p5, %p421_p2 }
  0x20   : > { %431 = shalt.err (!%p428_p6)
}
  0x21   : > { %337 = dma.hbm_to_vmem [thread:$0]  (!%p594_p10), %s137_s8, 64, %s140_s5, %s127_s17  }
  0x22   : > { %p145_p8 = pnand %p325_p11, %p144_p12 }
  0x23   : > { %s150_s22 = sand.u32 (!%p145_p8), 1, %s474_s10  }
  0x24   : > { %148 = sbr.rel (%p145_p8) target bundleno = 198 (0xc6), region = 24  ;;  %s326_s26 = sshll.u32 (!%p145_p8), %s150_s22, 2 }
  0x25   : > { %s151_s27 = scalar_lea.sflag (!%p145_p8), [#allocation3], %s150_s22  ;;  %s154_s28 = scalar_lea.vmem (!%p145_p8), [#allocation2], %s326_s26 }
  0x29   : > { %465 = dma.done.wait (%p574_p7), %s151_s27, 64  }
  0x2a   : > { %467 = vsyncadd (%p574_p7), %s151_s27, 4294967232  ;;  %p178_p9 = scmp.lt.s32.totalorder %s486_s13, 1  ;;  %p329_p10 = scmp.ne.s32.totalorder %s482_s12, 0 }
  0x2c   : > { %s666_s13 = smov (!%p178_p9, %s486_s13), 1  ;;  %189 = sbr.rel (%p329_p10) target bundleno = 51 (0x33), region = 32 }
  0x2d   : > { %s327_s30 = sshll.u32 %s666_s13, 2 }
  0x2e   : > { %s181_s5 = scalar_lea.vmem %s647_s1, %s327_s30  ;;  %s185_s8 = scalar_lea.vmem %s648_s2, %s327_s30 }
  0x31   : > { %vm190_vm0 = vcmask 3072   ;;  %v501_v0 = vmov 0.0  }
  0x32   : > { %191 = vst.msk [vmem:[%s181_s5] sm:$0xf] %vm190_vm0, %v501_v0  ;;  %192 = vst.msk [vmem:[%s185_s8] sm:$0xf] %vm190_vm0, %v501_v0 }
  0x33 PF: > { %v193_v1 = vld [vmem:[%s154_s28] sm:$0xf]  ;;  %vm195_vm1 = vcmask 1043456   ;;  %vm200_vm2 = vcmask 3072  }
  0x34   : > { %v196_v2 = vsel %vm195_vm1, %v193_v1, 0.0  ;;  %v203_v3 = vmul.f32 %v193_v1, %v193_v1 }
  0x35   : > { %197 = vadd.xlane.f32.xlu0 %v196_v2 }
  0x36   : > { %v204_v4 = vsel %vm195_vm1, %v203_v3, 0.0 }
  0x39   : > { %205 = vadd.xlane.f32.xlu0 %v204_v4  ;;  %v194_v5 = vld [vmem:[%s181_s5] sm:$0xf] }
  0x3a   : > { %v202_v8 = vld [vmem:[%s185_s8] sm:$0xf] }
  0xbe   : > { %v198_v6 = vpop.xlane.xlu0 %197 }
  0xbf   : > { %v199_v7 = vadd.f32 %v198_v6, %v194_v5 }
  0xc1   : > { %201 = vst.msk [vmem:[%s181_s5] sm:$0xf] %vm200_vm2, %v199_v7 }
  0xc2   : > { %v206_v9 = vpop.xlane.xlu0 %205 }
  0xc3   : > { %v207_v10 = vadd.f32 %v206_v9, %v202_v8 }
  0xc5   : > { %208 = vst.msk [vmem:[%s185_s8] sm:$0xf] %vm200_vm2, %v207_v10 }
  0xc6 PF: > { %s16_s16 = sadd.s32 1, %s498_s16   ;;  %s652_s9 = smov %s474_s10 }
  0xc7   : > { %p13_p7 = scmp.ge.s32.totalorder %s16_s16, 6   ;;  %s653_s10 = smov %s478_s11 }
  0xc8   : > { %s654_s11 = smov %s584_s29  ;;  %s655_s12 = smov %s490_s14 }
  0xc9   : > { %s656_s13 = smov %s494_s15  ;;  %s657_s14 = smov %s660_s18 }
  0xca   : > { %s658_s15 = smov %s664_s19  ;;  %15 = sbr.rel (!%p13_p7) target bundleno = 5 (0x5), region = 80 }
  0xcf   :  { %242 = vsyncpa [#allocation3], 1 }
  0xd0   :  { %244 = vsyncpa [#allocation3 + $0x1], 1 }

</bundles_post_ra>
